<compile_context>
chip_gen: v5e
topology: v5e:2x2
jax: 0.10.0
libtpu: 0.0.40
codegen_flags: <defaults>
</compile_context>

<pallas_src>
import jax
import jax.numpy as jnp
from jax.experimental import pallas as pl
from jax.experimental.pallas import tpu as pltpu

LANE = 128


def _round_up(x, m):
    return ((x + m - 1) // m) * m


def mlp_kernel(x_ref, w1_ref, b1_ref, w2_ref, b2_ref, w3_ref, b3_ref, o_ref):
    # x arrives as f32 (full HBM->VMEM DMA of the original data); the bf16 cast
    # rides in otherwise-idle VALU slots under the MXU pushes.
    x = x_ref[...].astype(jnp.bfloat16)                               # (TB, D_in)
    # fc1: bf16 operands on the MXU, f32 accumulation; bias + ReLU in f32.
    h1 = jnp.dot(x, w1_ref[...], preferred_element_type=jnp.float32) + b1_ref[...]
    h1 = jnp.maximum(h1, 0.0).astype(jnp.bfloat16)
    # fc2 + ReLU
    h2 = jnp.dot(h1, w2_ref[...], preferred_element_type=jnp.float32) + b2_ref[...]
    h2 = jnp.maximum(h2, 0.0).astype(jnp.bfloat16)
    # fc3 (no activation); N dim is lane-padded to 128 so this store is lane-dense.
    y = jnp.dot(h2, w3_ref[...], preferred_element_type=jnp.float32) + b3_ref[...]
    o_ref[...] = y.astype(o_ref.dtype)                                # bf16 writeback


def prepare_params(params):
    """One-time (cacheable) packing of the f32 params for the kernel:
       - fc3 weight/bias lane-padded from d_out (e.g. 10) to 128 zero columns,
       - matmul weights pre-cast to bf16 (biases stay f32 for the f32 bias-add).
    Call once per parameter update, not per forward call."""
    w1, b1 = params["w1"], params["b1"]                               # (d_in, H1), (1, H1)
    w2, b2 = params["w2"], params["b2"]                               # (H1, H2),  (1, H2)
    w3, b3 = params["w3"], params["b3"]                               # (H2, Dout),(1, Dout)
    d_out = w3.shape[1]
    padded_out = _round_up(d_out, LANE)
    if padded_out != d_out:
        w3 = jnp.pad(w3, ((0, 0), (0, padded_out - d_out)))
        b3 = jnp.pad(b3, ((0, 0), (0, padded_out - d_out)))
    return {
        "w1": w1.astype(jnp.bfloat16), "b1": b1,
        "w2": w2.astype(jnp.bfloat16), "b2": b2,
        "w3": w3.astype(jnp.bfloat16), "b3": b3,
        "d_out": d_out,
    }


def _choose_batch_tile(B):
    if B < 256:
        # Small batch: one grid step, near-zero padding. 16-row granularity keeps
        # the bf16 output block sublane-packed (x itself is f32, which only needs 8).
        return _round_up(max(B, 1), 16)
    # Large batch: fat tiles amortize the ~0.35us/step grid overhead (v5e/v6e),
    # while >= 2 parallel steps feed both v7x TensorCores. VMEM footprint at 512
    # rows is ~2 MiB double-buffered -- far under every generation's scoped limit.
    return min(512, _round_up(pl.cdiv(B, 2), 128))


def mlp_forward(x_nchw, prepared, *, batch_tile=None, out_dtype=jnp.float32):
    """x_nchw: (B, C, H, W) float32. prepared: output of prepare_params()."""
    B = x_nchw.shape[0]
    d_in = x_nchw.shape[1] * x_nchw.shape[2] * x_nchw.shape[3]
    x = x_nchw.reshape(B, d_in)                                       # nn.Flatten; stays f32

    w1, b1 = prepared["w1"], prepared["b1"]
    w2, b2 = prepared["w2"], prepared["b2"]
    w3, b3 = prepared["w3"], prepared["b3"]
    d_out = prepared["d_out"]
    h1, h2, padded_out = w1.shape[1], w2.shape[1], w3.shape[1]

    if batch_tile is None:
        batch_tile = _choose_batch_tile(B)
    batch_tile = _round_up(batch_tile, 16)

    # Pad only the ragged remainder of the batch (padded rows sliced off below).
    padded_b = _round_up(B, batch_tile)
    if padded_b != B:
        x = jnp.pad(x, ((0, padded_b - B), (0, 0)))

    grid = (padded_b // batch_tile,)

    out_padded = pl.pallas_call(
        mlp_kernel,
        out_shape=jax.ShapeDtypeStruct((padded_b, padded_out), jnp.bfloat16),
        grid_spec=pl.GridSpec(
            grid=grid,
            in_specs=[
                pl.BlockSpec((batch_tile, d_in), lambda i: (i, 0)),   # x tile over batch (f32)
                pl.BlockSpec((d_in, h1), lambda i: (0, 0)),           # weights resident in VMEM
                pl.BlockSpec((1, h1), lambda i: (0, 0)),
                pl.BlockSpec((h1, h2), lambda i: (0, 0)),
                pl.BlockSpec((1, h2), lambda i: (0, 0)),
                pl.BlockSpec((h2, padded_out), lambda i: (0, 0)),
                pl.BlockSpec((1, padded_out), lambda i: (0, 0)),
            ],
            out_specs=pl.BlockSpec((batch_tile, padded_out), lambda i: (i, 0)),
        ),
        compiler_params=pltpu.CompilerParams(
            dimension_semantics=("parallel",),
        ),
    )(x, w1, b1, w2, b2, w3, b3)

    # Slice off batch/lane padding and upcast in the same small XLA op.
    return out_padded[:B, :d_out].astype(out_dtype)


def init_params(key, d_in, h1, h2, d_out):
    """PyTorch nn.Linear default init (U(-1/sqrt(fan_in), +1/sqrt(fan_in))).
    Weights stored transposed: (in_features, out_features)."""
    ks = jax.random.split(key, 6)

    def lin(kw, kb, fan_in, fan_out):
        bound = 1.0 / jnp.sqrt(float(fan_in))
        w = jax.random.uniform(kw, (fan_in, fan_out), jnp.float32, -bound, bound)
        b = jax.random.uniform(kb, (1, fan_out), jnp.float32, -bound, bound)
        return w, b

    w1, b1 = lin(ks[0], ks[1], d_in, h1)
    w2, b2 = lin(ks[2], ks[3], h1, h2)
    w3, b3 = lin(ks[4], ks[5], h2, d_out)
    return {"w1": w1, "b1": b1, "w2": w2, "b2": b2, "w3": w3, "b3": b3}


def mlp_reference(x_nchw, params):
    x = x_nchw.reshape(x_nchw.shape[0], -1)
    h = jnp.maximum(x @ params["w1"] + params["b1"], 0.0)
    h = jnp.maximum(h @ params["w2"] + params["b2"], 0.0)
    return h @ params["w3"] + params["b3"]


if __name__ == "__main__":
    key = jax.random.PRNGKey(0)
    k_x, k_x2, k_p = jax.random.split(key, 3)

    # Shapes consistent with the module: input image (1, 16, 16) -> input_size=256,
    # hidden_size_1=256, hidden_size_2=128, output_size=10.
    C, H, W = 1, 16, 16
    d_in, h1, h2, d_out = C * H * W, 256, 128, 10

    params = init_params(k_p, d_in, h1, h2, d_out)
    prepared = prepare_params(params)     # one-time bf16 cast + fc3 lane-pad (cache this)

    # Small-batch path: B=8 -> single 16-row tile (no more 16x padding to 128 rows).
    B = 8
    x = jax.random.normal(k_x, (B, C, H, W), jnp.float32)
    out = jax.block_until_ready(mlp_forward(x, prepared))
    ref = mlp_reference(x, params)
    assert out.shape == (B, d_out)
    # bf16 matmul operands + bf16 output (f32 accumulation) -> loosened tolerance.
    assert jnp.allclose(out, ref, atol=3e-2, rtol=3e-2), "mismatch vs JAX reference (B=8)"

    # Larger ragged batch: exercises the multi-step parallel grid + remainder padding.
    B2 = 300
    x2 = jax.random.normal(k_x2, (B2, C, H, W), jnp.float32)
    out2 = jax.block_until_ready(mlp_forward(x2, prepared))
    ref2 = mlp_reference(x2, params)
    assert out2.shape == (B2, d_out)
    assert jnp.allclose(out2, ref2, atol=3e-2, rtol=3e-2), "mismatch vs JAX reference (B=300)"

    print("KERNEL_OK")
</pallas_src>

<mosaic_0001>
module attributes {stable_mosaic.version = 11 : i64} {
  func.func @mlp_kernel(%arg0: i32, %arg1: memref<16x256xf32, #tpu.memory_space<vmem>>, %arg2: memref<256x256xbf16, #tpu.memory_space<vmem>>, %arg3: memref<1x256xf32, #tpu.memory_space<vmem>>, %arg4: memref<256x128xbf16, #tpu.memory_space<vmem>>, %arg5: memref<1x128xf32, #tpu.memory_space<vmem>>, %arg6: memref<128x128xbf16, #tpu.memory_space<vmem>>, %arg7: memref<1x128xf32, #tpu.memory_space<vmem>>, %arg8: memref<16x128xbf16, #tpu.memory_space<vmem>>) attributes {dimension_semantics = [#tpu.dimension_semantics<parallel>], iteration_bounds = array<i64: 1>, scalar_prefetch = 0 : i64, scratch_operands = 0 : i64, tpu.core_type = #tpu.core_type<tc>, window_params = [{transform_indices = @transform_0, window_bounds = array<i64: 16, 256>}, {pipeline_mode = #tpu.pipeline_mode<synchronous>, transform_indices = @transform_1, window_bounds = array<i64: 256, 256>}, {pipeline_mode = #tpu.pipeline_mode<synchronous>, transform_indices = @transform_2, window_bounds = array<i64: 1, 256>}, {pipeline_mode = #tpu.pipeline_mode<synchronous>, transform_indices = @transform_3, window_bounds = array<i64: 256, 128>}, {pipeline_mode = #tpu.pipeline_mode<synchronous>, transform_indices = @transform_4, window_bounds = array<i64: 1, 128>}, {pipeline_mode = #tpu.pipeline_mode<synchronous>, transform_indices = @transform_5, window_bounds = array<i64: 128, 128>}, {pipeline_mode = #tpu.pipeline_mode<synchronous>, transform_indices = @transform_6, window_bounds = array<i64: 1, 128>}, {transform_indices = @transform_7, window_bounds = array<i64: 16, 128>}]} {
    %c0 = arith.constant 0 : index
    %c0_0 = arith.constant 0 : index
    %0 = vector.load %arg1[%c0, %c0_0] : memref<16x256xf32, #tpu.memory_space<vmem>>, vector<16x256xf32>
    %1 = arith.truncf %0 : vector<16x256xf32> to vector<16x256xbf16>
    %c0_1 = arith.constant 0 : index
    %c0_2 = arith.constant 0 : index
    %2 = vector.load %arg2[%c0_1, %c0_2] : memref<256x256xbf16, #tpu.memory_space<vmem>>, vector<256x256xbf16>
    %cst = arith.constant dense<0.000000e+00> : vector<16x256xf32>
    %3 = tpu.matmul %1, %2, %cst {dimension_numbers = #tpu.dot_dimension_numbers<[1], [0], [0], [1], [0, 0, 1, 1], [], []>} : vector<16x256xbf16>, vector<256x256xbf16>, vector<16x256xf32> -> vector<16x256xf32>
    %c0_3 = arith.constant 0 : index
    %c0_4 = arith.constant 0 : index
    %4 = vector.load %arg3[%c0_3, %c0_4] : memref<1x256xf32, #tpu.memory_space<vmem>>, vector<1x256xf32>
    %5 = vector.broadcast %4 : vector<1x256xf32> to vector<16x256xf32>
    %6 = arith.addf %3, %5 : vector<16x256xf32>
    %cst_5 = arith.constant 0.000000e+00 : f32
    %7 = vector.broadcast %cst_5 : f32 to vector<16x256xf32>
    %8 = arith.maximumf %6, %7 : vector<16x256xf32>
    %9 = arith.truncf %8 : vector<16x256xf32> to vector<16x256xbf16>
    %c0_6 = arith.constant 0 : index
    %c0_7 = arith.constant 0 : index
    %10 = vector.load %arg4[%c0_6, %c0_7] : memref<256x128xbf16, #tpu.memory_space<vmem>>, vector<256x128xbf16>
    %cst_8 = arith.constant dense<0.000000e+00> : vector<16x128xf32>
    %11 = tpu.matmul %9, %10, %cst_8 {dimension_numbers = #tpu.dot_dimension_numbers<[1], [0], [0], [1], [0, 0, 1, 1], [], []>} : vector<16x256xbf16>, vector<256x128xbf16>, vector<16x128xf32> -> vector<16x128xf32>
    %c0_9 = arith.constant 0 : index
    %c0_10 = arith.constant 0 : index
    %12 = vector.load %arg5[%c0_9, %c0_10] : memref<1x128xf32, #tpu.memory_space<vmem>>, vector<1x128xf32>
    %13 = vector.broadcast %12 : vector<1x128xf32> to vector<16x128xf32>
    %14 = arith.addf %11, %13 : vector<16x128xf32>
    %cst_11 = arith.constant 0.000000e+00 : f32
    %15 = vector.broadcast %cst_11 : f32 to vector<16x128xf32>
    %16 = arith.maximumf %14, %15 : vector<16x128xf32>
    %17 = arith.truncf %16 : vector<16x128xf32> to vector<16x128xbf16>
    %c0_12 = arith.constant 0 : index
    %c0_13 = arith.constant 0 : index
    %18 = vector.load %arg6[%c0_12, %c0_13] : memref<128x128xbf16, #tpu.memory_space<vmem>>, vector<128x128xbf16>
    %cst_14 = arith.constant dense<0.000000e+00> : vector<16x128xf32>
    %19 = tpu.matmul %17, %18, %cst_14 {dimension_numbers = #tpu.dot_dimension_numbers<[1], [0], [0], [1], [0, 0, 1, 1], [], []>} : vector<16x128xbf16>, vector<128x128xbf16>, vector<16x128xf32> -> vector<16x128xf32>
    %c0_15 = arith.constant 0 : index
    %c0_16 = arith.constant 0 : index
    %20 = vector.load %arg7[%c0_15, %c0_16] : memref<1x128xf32, #tpu.memory_space<vmem>>, vector<1x128xf32>
    %21 = vector.broadcast %20 : vector<1x128xf32> to vector<16x128xf32>
    %22 = arith.addf %19, %21 : vector<16x128xf32>
    %23 = arith.truncf %22 : vector<16x128xf32> to vector<16x128xbf16>
    %c0_17 = arith.constant 0 : index
    %c0_18 = arith.constant 0 : index
    %24 = vector.load %arg8[%c0_17, %c0_18] : memref<16x128xbf16, #tpu.memory_space<vmem>>, vector<16x128xbf16>
    tpu.vector_store %arg8[%c0_17, %c0_18], %23 {strides = array<i32>} : memref<16x128xbf16, #tpu.memory_space<vmem>>, vector<16x128xbf16>,
    return
  }
  func.func @transform_0(%arg0: i32) -> (i32, i32) {
    %c0_i32 = arith.constant 0 : i32
    %c0_i32_0 = arith.constant 0 : i32
    return %arg0, %c0_i32 : i32, i32
  }
  func.func @transform_1(%arg0: i32) -> (i32, i32) {
    %c0_i32 = arith.constant 0 : i32
    %c0_i32_0 = arith.constant 0 : i32
    %c0_i32_1 = arith.constant 0 : i32
    return %c0_i32, %c0_i32_0 : i32, i32
  }
  func.func @transform_2(%arg0: i32) -> (i32, i32) {
    %c0_i32 = arith.constant 0 : i32
    %c0_i32_0 = arith.constant 0 : i32
    %c0_i32_1 = arith.constant 0 : i32
    return %c0_i32, %c0_i32_0 : i32, i32
  }
  func.func @transform_3(%arg0: i32) -> (i32, i32) {
    %c0_i32 = arith.constant 0 : i32
    %c0_i32_0 = arith.constant 0 : i32
    %c0_i32_1 = arith.constant 0 : i32
    return %c0_i32, %c0_i32_0 : i32, i32
  }
  func.func @transform_4(%arg0: i32) -> (i32, i32) {
    %c0_i32 = arith.constant 0 : i32
    %c0_i32_0 = arith.constant 0 : i32
    %c0_i32_1 = arith.constant 0 : i32
    return %c0_i32, %c0_i32_0 : i32, i32
  }
  func.func @transform_5(%arg0: i32) -> (i32, i32) {
    %c0_i32 = arith.constant 0 : i32
    %c0_i32_0 = arith.constant 0 : i32
    %c0_i32_1 = arith.constant 0 : i32
    return %c0_i32, %c0_i32_0 : i32, i32
  }
  func.func @transform_6(%arg0: i32) -> (i32, i32) {
    %c0_i32 = arith.constant 0 : i32
    %c0_i32_0 = arith.constant 0 : i32
    %c0_i32_1 = arith.constant 0 : i32
    return %c0_i32, %c0_i32_0 : i32, i32
  }
  func.func @transform_7(%arg0: i32) -> (i32, i32) {
    %c0_i32 = arith.constant 0 : i32
    %c0_i32_0 = arith.constant 0 : i32
    return %arg0, %c0_i32 : i32, i32
  }
}

</mosaic_0001>

<bundles_post_ra>
// kernel: tpu_custom_call.1
= control target key start
LH: loop header
LB: loop body
LE: loop exit
PB: predicated region body
PF: predicated region fallthrough
CT: control target
= control target key end

     0   :  { %12 = vsyncpa [#allocation3], 0  ;;  %s1175_s0 = inlined_call_operand.hbm [shape: f32[16,256], index: 0, kind: input, shape index: {}]   ;;  %s1176_s1 = inlined_call_operand.hbm [shape: bf16[256,256], index: 1, kind: input, shape index: {}]   ;;  %s1177_s2 = inlined_call_operand.hbm [shape: f32[1,256], index: 2, kind: input, shape index: {}]   ;;  %s1178_s3 = inlined_call_operand.hbm [shape: bf16[256,128], index: 3, kind: input, shape index: {}]   ;;  %s1179_s4 = inlined_call_operand.vmem [shape: f32[1,128], index: 4, kind: input, shape index: {}]   ;;  %s1180_s5 = inlined_call_operand.hbm [shape: bf16[128,128], index: 5, kind: input, shape index: {}]   ;;  %s1181_s6 = inlined_call_operand.vmem [shape: f32[1,128], index: 6, kind: input, shape index: {}]   ;;  %s1182_s7 = inlined_call_operand.hbm [shape: bf16[16,128], index: 7, kind: output, shape index: {}]  }
   0x1   :  { %13 = vsyncpa [#allocation6], 0 }
   0x2   :  { %14 = vsyncpa [#allocation9], 0  ;;  %s33_s26 = sshll.u32 %s1176_s1, 4  ;;  %s34_s26 = int_to_ptr.hbm [resolvable:$true] %s33_s26 }
   0x3   :  { %15 = vsyncpa [#allocation4], 0  ;;  %s1090_s27 = smov [#allocation5]   ;;  %s57_s8 = sshll.u32 %s1178_s3, 4  ;;  %s58_s8 = int_to_ptr.hbm [resolvable:$true] %s57_s8 }
   0x4   :  { %s35_s28 = sshll.u32 %s1090_s27, 4  ;;  %s1091_s9 = smov 128   ;;  %s36_s28 = int_to_ptr.vmem [resolvable:$true] %s35_s28 }
   0x5   :  { %s1092_s10 = smov 8   ;;  %s1093_s11 = smov [#allocation8]  }
   0x6   :  { %41 = dma.hbm_to_vmem [thread:$0]  %s34_s26, 4096, %s36_s28, [#allocation6], %s1091_s9, %s1091_s9, %s1092_s10  }
   0x7   :  { %s59_s12 = sshll.u32 %s1093_s11, 4  ;;  %s1094_s13 = smov 64   ;;  %s60_s12 = int_to_ptr.vmem [resolvable:$true] %s59_s12 }
   0x8   :  { %s1095_s14 = smov 4   ;;  %s20_s16 = sshll.u32 %s1175_s0, 4  ;;  %s21_s16 = int_to_ptr.hbm [resolvable:$true] %s20_s16 }
   0x9   :  { %65 = dma.hbm_to_vmem [thread:$0]  %s58_s8, 2048, %s60_s12, [#allocation9], %s1094_s13, %s1094_s13, %s1095_s14  }
   0xa   :  { %s1096_s17 = smov [#allocation2]   ;;  %s47_s20 = sshll.u32 %s1177_s2, 4  ;;  %s48_s20 = int_to_ptr.hbm [resolvable:$true] %s47_s20 }
   0xb   :  { %s22_s3 = sshll.u32 %s1096_s17, 4  ;;  %s1097_s21 = smov 256   ;;  %s23_s3 = int_to_ptr.vmem [resolvable:$true] %s22_s3 }
   0xc   :  { %s1098_s22 = smov 16   ;;  %s1099_s23 = smov [#allocation7]  }
   0xd   :  { %28 = dma.hbm_to_vmem [thread:$0]  %s21_s16, 512, %s23_s3, [#allocation3], %s1097_s21, %s1097_s21, %s1098_s22  }
   0xe   :  { %s49_s24 = sshll.u32 %s1099_s23, 4  ;;  %s72_s27 = sshll.u32 %s1180_s5, 4  ;;  %s50_s24 = int_to_ptr.vmem [resolvable:$true] %s49_s24  ;;  %s73_s27 = int_to_ptr.hbm [resolvable:$true] %s72_s27 }
   0xf   :  { %52 = dma.hbm_to_vmem [thread:$0]  %s48_s20, 32, %s50_s24, [#allocation6]  }
  0x10   :  { %s1100_s0 = smov [#allocation10]  }
  0x11   :  { %s74_s28 = sshll.u32 %s1100_s0, 4  ;;  %s75_s28 = int_to_ptr.vmem [resolvable:$true] %s74_s28 }
  0x12   :  { %80 = dma.hbm_to_vmem [thread:$0]  %s73_s27, 1024, %s75_s28, [#allocation9], %s1094_s13, %s1094_s13, %s1095_s14  }
  0x13   :  { %1082 = dma.done.wait [#allocation3], 512  }
  0x14   :  { %1083 = vsyncadd [#allocation3], 4294966784 }
  0x15   :  { %1084 = dma.done.wait [#allocation6], 4128  }
  0x16   :  { %1085 = vsyncadd [#allocation6], 4294963168 }
  0x17   :  { %1086 = dma.done.wait [#allocation9], 3072  }
  0x18   :  { %1087 = vsyncadd [#allocation9], 4294964224  ;;  %v697_v0 = vld [vmem:[#allocation5 + $0x70] sm:$0xf]  ;;  %v878_v1 = vld [vmem:[#allocation5 + $0x74] sm:$0xf0] }
  0x19   :  { %v761_v2 = vld [vmem:[#allocation5 + $0xf0] sm:$0xf]  ;;  %v698_v3 = vor.u32 %v878_v1, %v697_v0  ;;  %v894_v4 = vld [vmem:[#allocation5 + $0xf4] sm:$0xf0]  ;;  %v877_v5 = vld [vmem:[#allocation5 + $0x74] sm:$0xf] }
  0x1a   :  { %v699_v6 = vld [vmem:[#allocation5 + $0x78] sm:$0xf0]  ;;  %v762_v7 = vor.u32 %v894_v4, %v761_v2  ;;  %v893_v9 = vld [vmem:[#allocation5 + $0xf4] sm:$0xf]  ;;  %v689_v11 = vld [vmem:[#allocation5 + $0x60] sm:$0xf] }
  0x1b   :  { %v702_v8 = vor.u32 %v877_v5, %v699_v6  ;;  %v763_v10 = vld [vmem:[#allocation5 + $0xf8] sm:$0xf0]  ;;  %307 = vmatpush.bf16.msra.mxu0 %v698_v3  ;;  %v876_v13 = vld [vmem:[#allocation5 + $0x64] sm:$0xf0]  ;;  %v753_v14 = vld [vmem:[#allocation5 + $0xe0] sm:$0xf] }
  0x1c   :  { %v766_v12 = vor.u32 %v893_v9, %v763_v10  ;;  %v892_v15 = vld [vmem:[#allocation5 + $0xe4] sm:$0xf0]  ;;  %321 = vmatpush.bf16.msra.mxu1 %v762_v7  ;;  %v690_v16 = vor.u32 %v876_v13, %v689_v11  ;;  %v875_v18 = vld [vmem:[#allocation5 + $0x64] sm:$0xf]  ;;  %v691_v19 = vld [vmem:[#allocation5 + $0x68] sm:$0xf0] }
  0x1d   :  { %335 = vmatpush.bf16.msra.mxu2 %v702_v8  ;;  %v754_v17 = vor.u32 %v892_v15, %v753_v14  ;;  %v891_v20 = vld [vmem:[#allocation5 + $0xe4] sm:$0xf]  ;;  %v694_v21 = vor.u32 %v875_v18, %v691_v19  ;;  %v755_v22 = vld [vmem:[#allocation5 + $0xe8] sm:$0xf0]  ;;  %v681_v23 = vld [vmem:[#allocation5 + $0x50] sm:$0xf] }
  0x1e   :  { %349 = vmatpush.bf16.msra.mxu3 %v766_v12  ;;  %v874_v24 = vld [vmem:[#allocation5 + $0x54] sm:$0xf0]  ;;  %v758_v25 = vor.u32 %v891_v20, %v755_v22  ;;  %v745_v26 = vld [vmem:[#allocation5 + $0xd0] sm:$0xf]  ;;  %v873_v28 = vld [vmem:[#allocation5 + $0x54] sm:$0xf] }
  0x1f   :  { %v890_v27 = vld [vmem:[#allocation5 + $0xd4] sm:$0xf0]  ;;  %308 = vmatpush.bf16.msra.mxu0 %v690_v16  ;;  %v682_v29 = vor.u32 %v874_v24, %v681_v23  ;;  %v683_v30 = vld [vmem:[#allocation5 + $0x58] sm:$0xf0]  ;;  %v889_v31 = vld [vmem:[#allocation5 + $0xd4] sm:$0xf] }
  0x20   :  { %v747_v32 = vld [vmem:[#allocation5 + $0xd8] sm:$0xf0]  ;;  %322 = vmatpush.bf16.msra.mxu1 %v754_v17  ;;  %v746_v33 = vor.u32 %v890_v27, %v745_v26  ;;  %v686_v34 = vor.u32 %v873_v28, %v683_v30  ;;  %v673_v35 = vld [vmem:[#allocation5 + $0x40] sm:$0xf]  ;;  %v872_v36 = vld [vmem:[#allocation5 + $0x44] sm:$0xf0] }
  0x21   :  { %336 = vmatpush.bf16.msra.mxu2 %v694_v21  ;;  %v737_v37 = vld [vmem:[#allocation5 + $0xc0] sm:$0xf]  ;;  %v750_v38 = vor.u32 %v889_v31, %v747_v32  ;;  %v888_v39 = vld [vmem:[#allocation5 + $0xc4] sm:$0xf0]  ;;  %v871_v40 = vld [vmem:[#allocation5 + $0x44] sm:$0xf]  ;;  %v674_v44 = vor.u32 %v872_v36, %v673_v35 }
  0x22   :  { %350 = vmatpush.bf16.msra.mxu3 %v758_v25  ;;  %v675_v41 = vld [vmem:[#allocation5 + $0x48] sm:$0xf0]  ;;  %v887_v42 = vld [vmem:[#allocation5 + $0xc4] sm:$0xf]  ;;  %v738_v45 = vor.u32 %v888_v39, %v737_v37  ;;  %v665_v47 = vld [vmem:[#allocation5 + $0x30] sm:$0xf] }
  0x23   :  { %v739_v43 = vld [vmem:[#allocation5 + $0xc8] sm:$0xf0]  ;;  %309 = vmatpush.bf16.msra.mxu0 %v682_v29  ;;  %v678_v46 = vor.u32 %v871_v40, %v675_v41  ;;  %v870_v48 = vld [vmem:[#allocation5 + $0x34] sm:$0xf0]  ;;  %v729_v49 = vld [vmem:[#allocation5 + $0xb0] sm:$0xf] }
  0x24   :  { %323 = vmatpush.bf16.msra.mxu1 %v746_v33  ;;  %v742_v50 = vor.u32 %v887_v42, %v739_v43  ;;  %v886_v51 = vld [vmem:[#allocation5 + $0xb4] sm:$0xf0]  ;;  %v869_v52 = vld [vmem:[#allocation5 + $0x34] sm:$0xf]  ;;  %v667_v53 = vld [vmem:[#allocation5 + $0x38] sm:$0xf0]  ;;  %v666_v56 = vor.u32 %v870_v48, %v665_v47 }
  0x25   :  { %337 = vmatpush.bf16.msra.mxu2 %v686_v34  ;;  %v885_v54 = vld [vmem:[#allocation5 + $0xb4] sm:$0xf]  ;;  %v731_v55 = vld [vmem:[#allocation5 + $0xb8] sm:$0xf0]  ;;  %v730_v57 = vor.u32 %v886_v51, %v729_v49  ;;  %v670_v58 = vor.u32 %v869_v52, %v667_v53  ;;  %v657_v59 = vld [vmem:[#allocation5 + $0x20] sm:$0xf] }
  0x26   :  { %351 = vmatpush.bf16.msra.mxu3 %v750_v38  ;;  %v868_v60 = vld [vmem:[#allocation5 + $0x24] sm:$0xf0]  ;;  %v721_v61 = vld [vmem:[#allocation5 + $0xa0] sm:$0xf]  ;;  %v734_v62 = vor.u32 %v885_v54, %v731_v55  ;;  %v867_v0 = vld [vmem:[#allocation5 + $0x24] sm:$0xf] }
  0x27   :  { %310 = vmatpush.bf16.msra.mxu0 %v674_v44  ;;  %v884_v63 = vld [vmem:[#allocation5 + $0xa4] sm:$0xf0]  ;;  %v659_v1 = vld [vmem:[#allocation5 + $0x28] sm:$0xf0]  ;;  %v883_v2 = vld [vmem:[#allocation5 + $0xa4] sm:$0xf]  ;;  %v658_v4 = vor.u32 %v868_v60, %v657_v59 }
  0x28   :  { %324 = vmatpush.bf16.msra.mxu1 %v738_v45  ;;  %v723_v3 = vld [vmem:[#allocation5 + $0xa8] sm:$0xf0]  ;;  %v722_v5 = vor.u32 %v884_v63, %v721_v61  ;;  %v662_v6 = vor.u32 %v867_v0, %v659_v1  ;;  %v649_v7 = vld [vmem:[#allocation5 + $0x10] sm:$0xf]  ;;  %v866_v8 = vld [vmem:[#allocation5 + $0x14] sm:$0xf0] }
  0x29   :  { %338 = vmatpush.bf16.msra.mxu2 %v678_v46  ;;  %v713_v9 = vld [vmem:[#allocation5 + $0x90] sm:$0xf]  ;;  %v726_v10 = vor.u32 %v883_v2, %v723_v3  ;;  %v882_v11 = vld [vmem:[#allocation5 + $0x94] sm:$0xf0]  ;;  %v865_v12 = vld [vmem:[#allocation5 + $0x14] sm:$0xf]  ;;  %v650_v16 = vor.u32 %v866_v8, %v649_v7 }
  0x2a   :  { %352 = vmatpush.bf16.msra.mxu3 %v742_v50  ;;  %v651_v13 = vld [vmem:[#allocation5 + $0x18] sm:$0xf0]  ;;  %v881_v14 = vld [vmem:[#allocation5 + $0x94] sm:$0xf]  ;;  %v641_v17 = vld [vmem:[#allocation5] sm:$0xf]  ;;  %v714_v19 = vor.u32 %v882_v11, %v713_v9 }
  0x2b   :  { %311 = vmatpush.bf16.msra.mxu0 %v666_v56  ;;  %v715_v15 = vld [vmem:[#allocation5 + $0x98] sm:$0xf0]  ;;  %v864_v18 = vld [vmem:[#allocation5 + $0x4] sm:$0xf0]  ;;  %v654_v20 = vor.u32 %v865_v12, %v651_v13  ;;  %v705_v21 = vld [vmem:[#allocation5 + $0x80] sm:$0xf] }
  0x2c   :  { %325 = vmatpush.bf16.msra.mxu1 %v730_v57  ;;  %v880_v22 = vld [vmem:[#allocation5 + $0x84] sm:$0xf0]  ;;  %v863_v23 = vld [vmem:[#allocation5 + $0x4] sm:$0xf]  ;;  %v718_v24 = vor.u32 %v881_v14, %v715_v15  ;;  %v643_v25 = vld [vmem:[#allocation5 + $0x8] sm:$0xf0]  ;;  %v642_v28 = vor.u32 %v864_v18, %v641_v17 }
  0x2d   :  { %339 = vmatpush.bf16.msra.mxu2 %v670_v58  ;;  %v879_v26 = vld [vmem:[#allocation5 + $0x84] sm:$0xf]  ;;  %v707_v27 = vld [vmem:[#allocation5 + $0x88] sm:$0xf0]  ;;  %v105_v30 = vld [vmem:[#allocation2 + $0x10] sm:$0xff]  ;;  %v706_v31 = vor.u32 %v880_v22, %v705_v21  ;;  %v646_v32 = vor.u32 %v863_v23, %v643_v25  ;;  %s1101_s8 = smov [#allocation11]  }
  0x2e   :  { %353 = vmatpush.bf16.msra.mxu3 %v734_v62  ;;  %v103_v29 = vld [vmem:[#allocation2] sm:$0xff]  ;;  %v104_v33 = vld [vmem:[#allocation2 + $0x8] sm:$0xff]  ;;  %v106_v34 = vld [vmem:[#allocation2 + $0x18] sm:$0xff]  ;;  %v710_v35 = vor.u32 %v879_v26, %v707_v27  ;;  %s622_s9 = sshll.u32 %s1101_s8, 4  ;;  %s624_s11 = sshll.u32 %s1182_s7, 4  ;;  %s623_s9 = int_to_ptr.vmem [resolvable:$true] %s622_s9  ;;  %s625_s11 = int_to_ptr.hbm [resolvable:$true] %s624_s11 }
  0x2f   :  { %312 = vmatpush.bf16.msra.mxu0 %v658_v4  ;;  %v902_v36 = vld [vmem:[#allocation8 + $0x38] sm:$0xff]  ;;  %v107_v37 = vpack.c.bf16 %v105_v30, %v103_v29  ;;  %v108_v39 = vpack.c.bf16 %v106_v34, %v104_v33  ;;  %v901_v40 = vld [vmem:[#allocation8 + $0x30] sm:$0xff]  ;;  %v900_v42 = vld [vmem:[#allocation8 + $0x28] sm:$0xff] }
  0x30   :  { %326 = vmatpush.bf16.msra.mxu1 %v722_v5  ;;  %v910_v38 = vld [vmem:[#allocation8 + $0x78] sm:$0xff]  ;;  %v909_v41 = vld [vmem:[#allocation8 + $0x70] sm:$0xff]  ;;  %v899_v43 = vld [vmem:[#allocation8 + $0x20] sm:$0xff] }
  0x31   :  { %340 = vmatpush.bf16.msra.mxu2 %v662_v6  ;;  %v908_v44 = vld [vmem:[#allocation8 + $0x68] sm:$0xff]  ;;  %v898_v45 = vld [vmem:[#allocation8 + $0x18] sm:$0xff]  ;;  %v907_v46 = vld [vmem:[#allocation8 + $0x60] sm:$0xff] }
  0x32   :  { %354 = vmatpush.bf16.msra.mxu3 %v726_v10  ;;  %v897_v47 = vld [vmem:[#allocation8 + $0x10] sm:$0xff]  ;;  %v906_v48 = vld [vmem:[#allocation8 + $0x58] sm:$0xff]  ;;  %v896_v49 = vld [vmem:[#allocation8 + $0x8] sm:$0xff] }
  0x33   :  { %313 = vmatpush.bf16.msra.mxu0 %v650_v16  ;;  %v905_v50 = vld [vmem:[#allocation8 + $0x50] sm:$0xff]  ;;  %v895_v51 = vld [vmem:[#allocation8] sm:$0xff]  ;;  %v904_v52 = vld [vmem:[#allocation8 + $0x48] sm:$0xff] }
  0x34   :  { %327 = vmatpush.bf16.msra.mxu1 %v714_v19  ;;  %v903_v53 = vld [vmem:[#allocation8 + $0x40] sm:$0xff]  ;;  %v918_v54 = vld [vmem:[#allocation10 + $0x38] sm:$0xff]  ;;  %v917_v55 = vld [vmem:[#allocation10 + $0x30] sm:$0xff] }
  0x35   :  { %341 = vmatpush.bf16.msra.mxu2 %v654_v20  ;;  %v141_v56 = vld [vmem:[#allocation7] sm:$0x3]  ;;  %v916_v57 = vld [vmem:[#allocation10 + $0x28] sm:$0xff]  ;;  %v915_v18 = vld [vmem:[#allocation10 + $0x20] sm:$0xff] }
  0x36   :  { %355 = vmatpush.bf16.msra.mxu3 %v718_v24  ;;  %v143_v59 = vperm.slane %v141_v56, 0  ;;  %v144_v63 = vperm.slane %v141_v56, 1  ;;  %v914_v19 = vld [vmem:[#allocation10 + $0x18] sm:$0xff]  ;;  %v913_v20 = vld [vmem:[#allocation10 + $0x10] sm:$0xff]  ;;  %v912_v21 = vld [vmem:[#allocation10 + $0x8] sm:$0xff] }
  0x37   :  { %314 = vmatpush.bf16.msra.mxu0 %v642_v28  ;;  %v911_v22 = vld [vmem:[#allocation10] sm:$0xff]  ;;  %v936_v25 = vld [vmem:[%s1179_s4] ss:$0 sm:$0xff] }
  0x38   :  { %328 = vmatpush.bf16.msra.mxu1 %v706_v31 }
  0x39   :  { %342 = vmatpush.bf16.msra.mxu2 %v646_v32 }
  0x3a   :  { %356 = vmatpush.bf16.msra.mxu3 %v710_v35  ;;  %315 = vmatmul.bf16.vlgmr.msra.gmra.mxu0 %v107_v37 }
  0x3b   :  { %501 = vmatpush.bf16.msrb.mxu0 %v902_v36  ;;  %329 = vmatmul.bf16.vlgmr.msra.gmra.mxu1 %v108_v39  ;;  %v937_v36 = vld [vmem:[%s1181_s6] ss:$0 sm:$0xff] }
  0x3c   :  { %515 = vmatpush.bf16.msrb.mxu1 %v910_v38  ;;  %343 = vmatmul.bf16.vlgmr.msra.gmra.mxu2 %v107_v37 }
  0x3d   :  { %357 = vmatmul.bf16.vlgmr.msra.gmra.mxu3 %v108_v39  ;;  %600 = vmatpush.bf16.msrb.mxu2 %v918_v54 }
  0x3f   :  { %502 = vmatpush.bf16.msrb.mxu0 %v901_v40 }
  0x40   :  { %516 = vmatpush.bf16.msrb.mxu1 %v909_v41 }
  0x41   :  { %601 = vmatpush.bf16.msrb.mxu2 %v917_v55 }
  0x43   :  { %503 = vmatpush.bf16.msrb.mxu0 %v900_v42 }
  0x44   :  { %517 = vmatpush.bf16.msrb.mxu1 %v908_v44 }
  0x45   :  { %602 = vmatpush.bf16.msrb.mxu2 %v916_v57 }
  0x47   :  { %504 = vmatpush.bf16.msrb.mxu0 %v899_v43 }
  0x48   :  { %518 = vmatpush.bf16.msrb.mxu1 %v907_v46 }
  0x49   :  { %603 = vmatpush.bf16.msrb.mxu2 %v915_v18 }
  0x4b   :  { %505 = vmatpush.bf16.msrb.mxu0 %v898_v45 }
  0x4c   :  { %519 = vmatpush.bf16.msrb.mxu1 %v906_v48 }
  0x4d   :  { %604 = vmatpush.bf16.msrb.mxu2 %v914_v19 }
  0x4f   :  { %506 = vmatpush.bf16.msrb.mxu0 %v897_v47 }
  0x50   :  { %520 = vmatpush.bf16.msrb.mxu1 %v905_v50 }
  0x51   :  { %605 = vmatpush.bf16.msrb.mxu2 %v913_v20 }
  0x53   :  { %507 = vmatpush.bf16.msrb.mxu0 %v896_v49 }
  0x54   :  { %521 = vmatpush.bf16.msrb.mxu1 %v904_v52 }
  0x55   :  { %606 = vmatpush.bf16.msrb.mxu2 %v912_v21 }
  0x57   :  { %508 = vmatpush.bf16.msrb.mxu0 %v895_v51 }
  0x58   :  { %522 = vmatpush.bf16.msrb.mxu1 %v903_v53 }
  0x59   :  { %607 = vmatpush.bf16.msrb.mxu2 %v911_v22 }
  0xb7   :  { %v316_v58 = vpop.f32.mrf.mxu0 }
  0xb8   :  { %v330_v60 = vpop.f32.mrf.mxu1  ;;  %v317_v61 = vadd.f32 %v316_v58, %v143_v59 }
  0xba   :  { %v331_v2 = vadd.f32 %v330_v60, %v317_v61 }
  0xbc   :  { %v363_v7 = vmax.f32 %v331_v2, 0.0 }
  0xbf   :  { %v344_v62 = vpop.f32.mrf.mxu2  ;;  %v318_v1 = vpop.f32.mrf.mxu0 }
  0xc0   :  { %v358_v0 = vpop.f32.mrf.mxu3  ;;  %v319_v3 = vadd.f32 %v318_v1, %v143_v59  ;;  %v332_v4 = vpop.f32.mrf.mxu1  ;;  %v345_v6 = vadd.f32 %v344_v62, %v144_v63 }
  0xc2   :  { %v333_v5 = vadd.f32 %v332_v4, %v319_v3  ;;  %v359_v11 = vadd.f32 %v358_v0, %v345_v6 }
  0xc4   :  { %v365_v8 = vmax.f32 %v333_v5, 0.0  ;;  %v364_v15 = vmax.f32 %v359_v11, 0.0 }
  0xc6   :  { %v367_v9 = vpack.c.bf16 %v365_v8, %v363_v7 }
  0xc7   :  { %v346_v10 = vpop.f32.mrf.mxu2 }
  0xc8   :  { %v347_v12 = vadd.f32 %v346_v10, %v144_v63  ;;  %v360_v13 = vpop.f32.mrf.mxu3  ;;  %509 = vmatmul.bf16.vlgmr.msrb.gmra.mxu0 %v367_v9 }
  0xca   :  { %v361_v14 = vadd.f32 %v360_v13, %v347_v12 }
  0xcc   :  { %v366_v16 = vmax.f32 %v361_v14, 0.0 }
  0xce   :  { %v368_v17 = vpack.c.bf16 %v366_v16, %v364_v15 }
  0xd0   :  { %523 = vmatmul.bf16.vlgmr.msrb.gmra.mxu1 %v368_v17 }
 0x145   :  { %v510_v23 = vpop.f32.mrf.mxu0 }
 0x146   :  { %v511_v27 = vadd.f32 %v936_v25, %v510_v23 }
 0x14d   :  { %v524_v24 = vpop.f32.mrf.mxu1  ;;  %v512_v26 = vpop.f32.mrf.mxu0 }
 0x14e   :  { %v525_v28 = vadd.f32 %v524_v24, %v511_v27  ;;  %v513_v29 = vadd.f32 %v936_v25, %v512_v26 }
 0x150   :  { %v529_v32 = vmax.f32 %v525_v28, 0.0 }
 0x155   :  { %v526_v30 = vpop.f32.mrf.mxu1 }
 0x156   :  { %v527_v31 = vadd.f32 %v526_v30, %v513_v29 }
 0x158   :  { %v530_v33 = vmax.f32 %v527_v31, 0.0 }
 0x15a   :  { %v531_v34 = vpack.c.bf16 %v530_v33, %v529_v32 }
 0x15c   :  { %608 = vmatmul.bf16.vlgmr.msrb.gmra.mxu2 %v531_v34 }
 0x1df   :  { %v609_v35 = vpop.f32.mrf.mxu2 }
 0x1e0   :  { %v610_v38 = vadd.f32 %v937_v36, %v609_v35 }
 0x1e7   :  { %v611_v37 = vpop.f32.mrf.mxu2 }
 0x1e8   :  { %v612_v39 = vadd.f32 %v937_v36, %v611_v37 }
 0x1ea   :  { %v922_v40 = vpack.c.bf16 %v612_v39, %v610_v38 }
 0x1ec   :  { %923 = vst [vmem:[#allocation11] sm:$0xff] %v922_v40  }
 0x1ed   :  { %630 = dma.vmem_to_hbm [thread:$0]  %s623_s9, 128, %s625_s11, [#allocation4], %s1094_s13, %s1094_s13, %s1095_s14  }
 0x1ee   :  { %1088 = dma.done.wait [#allocation4], 128  }
 0x1ef   :  { %1089 = vsyncadd [#allocation4], 4294967168 }
 0x1f0   :  { %635 = vsyncpa [#allocation3], 1 }
 0x1f1   :  { %636 = vsyncpa [#allocation6], 1 }
 0x1f2   :  { %637 = vsyncpa [#allocation9], 1 }
 0x1f3   :  { %638 = vsyncpa [#allocation4], 1 }

</bundles_post_ra>
